<compile_context>
chip_gen: v7x
topology: tpu7x:2x2x1
jax: 0.10.0
libtpu: 0.0.40
codegen_flags: <defaults>
</compile_context>

<pallas_src>
import functools

import jax
import jax.numpy as jnp
from jax.experimental import pallas as pl
from jax.experimental.pallas import tpu as pltpu

LANE = 128      # lane width (last dim alignment)
SUBLANE = 8     # f32 sublane count (second-to-last dim alignment)


def _round_up(x: int, m: int) -> int:
    return ((x + m - 1) // m) * m


# ---------------------------------------------------------------------------
# Kernel
# ---------------------------------------------------------------------------
def _fused_mlp_kernel(*refs, n_layers: int):
    # refs layout: x_ref, (wt_ref, b_ref) * n_layers, o_ref
    #   x_ref:  (TB, in0_pad)        f32 activation tile
    #   wt_ref: (in_pad, out_pad)    bf16 pre-transposed, zero-padded weight (W.T)
    #   b_ref:  (1, out_pad)         f32 zero-padded bias
    #   o_ref:  (TB, out_pad)        f32 output tile (lane-dense)
    x_ref = refs[0]
    o_ref = refs[-1]

    h = x_ref[...]  # f32
    for i in range(n_layers):
        wt = refs[1 + 2 * i][...]   # bf16
        b = refs[2 + 2 * i][...]    # f32
        h = jnp.dot(h.astype(jnp.bfloat16), wt,
                    preferred_element_type=jnp.float32) + b
        if i != n_layers - 1:
            h = jnp.maximum(h, 0.0)
    o_ref[...] = h  # f32


# ---------------------------------------------------------------------------
# pallas_call wrapper
# ---------------------------------------------------------------------------
def fused_mlp(xp, prepared_params, *, tb=SUBLANE):
    """Single-kernel MLP forward on padded, lane-dense tensors.

    xp:              (Bp, in0_pad) f32, Bp % tb == 0, in0_pad % 128 == 0
    prepared_params: list of (W.T padded bf16 (in_pad, out_pad), bias f32 (1, out_pad))
    returns          (Bp, out_pad_last) f32
    """
    Bp, in_pad = xp.shape
    n_layers = len(prepared_params)
    out_pad = prepared_params[-1][0].shape[1]

    flat_params = []
    in_specs = [pl.BlockSpec((tb, in_pad), lambda i: (i, 0))]
    for wt, b in prepared_params:
        flat_params.append(wt)
        flat_params.append(b)
        # Weights / biases stay resident across the batch grid (same block index).
        in_specs.append(pl.BlockSpec(wt.shape, lambda i: (0, 0)))
        in_specs.append(pl.BlockSpec(b.shape, lambda i: (0, 0)))
    out_spec = pl.BlockSpec((tb, out_pad), lambda i: (i, 0))

    grid = (pl.cdiv(Bp, tb),)

    # Advisory cost estimate for XLA scheduling.
    flops = 2 * Bp * sum(wt.shape[0] * wt.shape[1] for wt, _ in prepared_params)
    param_bytes = sum(wt.size * wt.dtype.itemsize + b.size * b.dtype.itemsize
                      for wt, b in prepared_params)
    bytes_accessed = xp.size * 4 + param_bytes + Bp * out_pad * 4
    cost = pl.CostEstimate(flops=flops, transcendentals=0,
                           bytes_accessed=bytes_accessed)

    # Explicit VMEM limit sized to the resident footprint (double-buffered batch
    # tiles + all weights/biases), capped under v7x's 64 MiB physical VMEM.
    tile_bytes = 2 * (tb * in_pad * 4 + tb * out_pad * 4)
    vmem_limit = int(min(max(2 * (param_bytes + tile_bytes) + (8 << 20), 16 << 20),
                         64 << 20))

    kernel = functools.partial(_fused_mlp_kernel, n_layers=n_layers)
    return pl.pallas_call(
        kernel,
        out_shape=jax.ShapeDtypeStruct((Bp, out_pad), jnp.float32),
        grid=grid,
        in_specs=in_specs,
        out_specs=out_spec,
        compiler_params=pltpu.CompilerParams(
            dimension_semantics=("parallel",),
            vmem_limit_bytes=vmem_limit),
        cost_estimate=cost,
    )(xp, *flat_params)


# ---------------------------------------------------------------------------
# Parameter init / layout prep
# ---------------------------------------------------------------------------
def init_params(sizes, key):
    """nn.Linear-style init: W (out, in), b (out,), f32."""
    params = []
    for i in range(len(sizes) - 1):
        key, kw, kb = jax.random.split(key, 3)
        fan_in = sizes[i]
        bound = 1.0 / jnp.sqrt(fan_in)
        w = jax.random.uniform(kw, (sizes[i + 1], sizes[i]),
                               minval=-bound, maxval=bound, dtype=jnp.float32)
        b = jax.random.uniform(kb, (sizes[i + 1],),
                               minval=-bound, maxval=bound, dtype=jnp.float32)
        params.append((w, b))
    return params


def prepare_params(params):
    """One-time layout prep (off the hot path):
       W -> W.T zero-padded to (in_pad, out_pad) in bf16,
       b -> (1, out_pad) zero-padded in f32.
       Zero padding is exact: padded input lanes are zero, padded output lanes
       stay zero through bias/ReLU and never influence real lanes downstream."""
    prepared = []
    for w, b in params:
        out_f, in_f = w.shape
        in_pad = _round_up(in_f, LANE)
        out_pad = _round_up(out_f, LANE)
        wt = jnp.zeros((in_pad, out_pad), dtype=jnp.bfloat16)
        wt = wt.at[:in_f, :out_f].set(w.T.astype(jnp.bfloat16))
        bp = jnp.zeros((1, out_pad), dtype=jnp.float32)
        bp = bp.at[:, :out_f].set(b.astype(jnp.float32).reshape(1, -1))
        prepared.append((wt, bp))
    return prepared


# ---------------------------------------------------------------------------
# End-to-end forward (Flatten -> pad -> fused kernel -> slice)
# ---------------------------------------------------------------------------
@functools.partial(jax.jit, static_argnames=("out_features", "tb"))
def neural_network_forward(x, prepared_params, out_features, tb=SUBLANE):
    B = x.shape[0]
    h = x.reshape(B, -1).astype(jnp.float32)          # nn.Flatten (row-major)

    in_f = h.shape[1]
    in_pad = prepared_params[0][0].shape[0]
    Bp = _round_up(B, tb)
    h = jnp.pad(h, ((0, Bp - B), (0, in_pad - in_f)))  # lane/sublane-dense input

    yp = fused_mlp(h, prepared_params, tb=tb)
    return yp[:B, :out_features]                       # strip padding outside kernel


def _reference_forward(x, params):
    """Pure-JAX f32 reference matching the PyTorch module."""
    B = x.shape[0]
    h = x.reshape(B, -1).astype(jnp.float32)
    n_layers = len(params)
    for idx, (w, b) in enumerate(params):
        h = h @ w.T + b
        if idx != n_layers - 1:
            h = jnp.maximum(h, 0.0)
    return h


if __name__ == "__main__":
    key = jax.random.PRNGKey(0)
    key, kx, kp = jax.random.split(key, 3)

    # sizes[0] must equal the flattened feature count: 2*4*4 = 32
    sizes = [32, 64, 48, 16]
    batch, channels, H, W = 8, 2, 4, 4   # batch >= 8 for full sublane utilization

    x = jax.random.normal(kx, (batch, channels, H, W), dtype=jnp.float32)
    params = init_params(sizes, kp)
    prepared = prepare_params(params)    # one-time pad/transpose/bf16 cast

    out = neural_network_forward(x, prepared, out_features=sizes[-1])
    out = jax.block_until_ready(out)

    ref = _reference_forward(x, params)
    assert out.shape == (batch, sizes[-1]), out.shape
    # bf16 matmul operands with f32 accumulation -> relaxed tolerance vs f32 ref.
    assert jnp.allclose(out, ref, atol=3e-2, rtol=3e-2), (
        float(jnp.max(jnp.abs(out - ref))))

    print("KERNEL_OK")
</pallas_src>

<mosaic_0001>
module attributes {stable_mosaic.version = 11 : i64} {
  func.func @_fused_mlp_kernel(%arg0: i32, %arg1: memref<8x128xf32, #tpu.memory_space<vmem>>, %arg2: memref<128x128xbf16, #tpu.memory_space<vmem>>, %arg3: memref<1x128xf32, #tpu.memory_space<vmem>>, %arg4: memref<128x128xbf16, #tpu.memory_space<vmem>>, %arg5: memref<1x128xf32, #tpu.memory_space<vmem>>, %arg6: memref<128x128xbf16, #tpu.memory_space<vmem>>, %arg7: memref<1x128xf32, #tpu.memory_space<vmem>>, %arg8: memref<8x128xf32, #tpu.memory_space<vmem>>) attributes {dimension_semantics = [#tpu.dimension_semantics<parallel>], iteration_bounds = array<i64: 1>, scalar_prefetch = 0 : i64, scratch_operands = 0 : i64, tpu.core_type = #tpu.core_type<tc>, window_params = [{transform_indices = @transform_0, window_bounds = array<i64: 8, 128>}, {pipeline_mode = #tpu.pipeline_mode<synchronous>, transform_indices = @transform_1, window_bounds = array<i64: 128, 128>}, {pipeline_mode = #tpu.pipeline_mode<synchronous>, transform_indices = @transform_2, window_bounds = array<i64: 1, 128>}, {pipeline_mode = #tpu.pipeline_mode<synchronous>, transform_indices = @transform_3, window_bounds = array<i64: 128, 128>}, {pipeline_mode = #tpu.pipeline_mode<synchronous>, transform_indices = @transform_4, window_bounds = array<i64: 1, 128>}, {pipeline_mode = #tpu.pipeline_mode<synchronous>, transform_indices = @transform_5, window_bounds = array<i64: 128, 128>}, {pipeline_mode = #tpu.pipeline_mode<synchronous>, transform_indices = @transform_6, window_bounds = array<i64: 1, 128>}, {transform_indices = @transform_7, window_bounds = array<i64: 8, 128>}]} {
    %c0 = arith.constant 0 : index
    %c0_0 = arith.constant 0 : index
    %0 = vector.load %arg1[%c0, %c0_0] : memref<8x128xf32, #tpu.memory_space<vmem>>, vector<8x128xf32>
    %c0_1 = arith.constant 0 : index
    %c0_2 = arith.constant 0 : index
    %1 = vector.load %arg2[%c0_1, %c0_2] : memref<128x128xbf16, #tpu.memory_space<vmem>>, vector<128x128xbf16>
    %c0_3 = arith.constant 0 : index
    %c0_4 = arith.constant 0 : index
    %2 = vector.load %arg3[%c0_3, %c0_4] : memref<1x128xf32, #tpu.memory_space<vmem>>, vector<1x128xf32>
    %3 = arith.truncf %0 : vector<8x128xf32> to vector<8x128xbf16>
    %cst = arith.constant dense<0.000000e+00> : vector<8x128xf32>
    %4 = tpu.matmul %3, %1, %cst {dimension_numbers = #tpu.dot_dimension_numbers<[1], [0], [0], [1], [0, 0, 1, 1], [], []>} : vector<8x128xbf16>, vector<128x128xbf16>, vector<8x128xf32> -> vector<8x128xf32>
    %5 = vector.broadcast %2 : vector<1x128xf32> to vector<8x128xf32>
    %6 = arith.addf %4, %5 : vector<8x128xf32>
    %cst_5 = arith.constant 0.000000e+00 : f32
    %7 = vector.broadcast %cst_5 : f32 to vector<8x128xf32>
    %8 = arith.maximumf %6, %7 : vector<8x128xf32>
    %c0_6 = arith.constant 0 : index
    %c0_7 = arith.constant 0 : index
    %9 = vector.load %arg4[%c0_6, %c0_7] : memref<128x128xbf16, #tpu.memory_space<vmem>>, vector<128x128xbf16>
    %c0_8 = arith.constant 0 : index
    %c0_9 = arith.constant 0 : index
    %10 = vector.load %arg5[%c0_8, %c0_9] : memref<1x128xf32, #tpu.memory_space<vmem>>, vector<1x128xf32>
    %11 = arith.truncf %8 : vector<8x128xf32> to vector<8x128xbf16>
    %cst_10 = arith.constant dense<0.000000e+00> : vector<8x128xf32>
    %12 = tpu.matmul %11, %9, %cst_10 {dimension_numbers = #tpu.dot_dimension_numbers<[1], [0], [0], [1], [0, 0, 1, 1], [], []>} : vector<8x128xbf16>, vector<128x128xbf16>, vector<8x128xf32> -> vector<8x128xf32>
    %13 = vector.broadcast %10 : vector<1x128xf32> to vector<8x128xf32>
    %14 = arith.addf %12, %13 : vector<8x128xf32>
    %cst_11 = arith.constant 0.000000e+00 : f32
    %15 = vector.broadcast %cst_11 : f32 to vector<8x128xf32>
    %16 = arith.maximumf %14, %15 : vector<8x128xf32>
    %c0_12 = arith.constant 0 : index
    %c0_13 = arith.constant 0 : index
    %17 = vector.load %arg6[%c0_12, %c0_13] : memref<128x128xbf16, #tpu.memory_space<vmem>>, vector<128x128xbf16>
    %c0_14 = arith.constant 0 : index
    %c0_15 = arith.constant 0 : index
    %18 = vector.load %arg7[%c0_14, %c0_15] : memref<1x128xf32, #tpu.memory_space<vmem>>, vector<1x128xf32>
    %19 = arith.truncf %16 : vector<8x128xf32> to vector<8x128xbf16>
    %cst_16 = arith.constant dense<0.000000e+00> : vector<8x128xf32>
    %20 = tpu.matmul %19, %17, %cst_16 {dimension_numbers = #tpu.dot_dimension_numbers<[1], [0], [0], [1], [0, 0, 1, 1], [], []>} : vector<8x128xbf16>, vector<128x128xbf16>, vector<8x128xf32> -> vector<8x128xf32>
    %21 = vector.broadcast %18 : vector<1x128xf32> to vector<8x128xf32>
    %22 = arith.addf %20, %21 : vector<8x128xf32>
    %c0_17 = arith.constant 0 : index
    %c0_18 = arith.constant 0 : index
    %23 = vector.load %arg8[%c0_17, %c0_18] : memref<8x128xf32, #tpu.memory_space<vmem>>, vector<8x128xf32>
    tpu.vector_store %arg8[%c0_17, %c0_18], %22 {strides = array<i32>} : memref<8x128xf32, #tpu.memory_space<vmem>>, vector<8x128xf32>,
    return
  }
  func.func @transform_0(%arg0: i32) -> (i32, i32) {
    %c0_i32 = arith.constant 0 : i32
    %c0_i32_0 = arith.constant 0 : i32
    return %arg0, %c0_i32 : i32, i32
  }
  func.func @transform_1(%arg0: i32) -> (i32, i32) {
    %c0_i32 = arith.constant 0 : i32
    %c0_i32_0 = arith.constant 0 : i32
    %c0_i32_1 = arith.constant 0 : i32
    return %c0_i32, %c0_i32_0 : i32, i32
  }
  func.func @transform_2(%arg0: i32) -> (i32, i32) {
    %c0_i32 = arith.constant 0 : i32
    %c0_i32_0 = arith.constant 0 : i32
    %c0_i32_1 = arith.constant 0 : i32
    return %c0_i32, %c0_i32_0 : i32, i32
  }
  func.func @transform_3(%arg0: i32) -> (i32, i32) {
    %c0_i32 = arith.constant 0 : i32
    %c0_i32_0 = arith.constant 0 : i32
    %c0_i32_1 = arith.constant 0 : i32
    return %c0_i32, %c0_i32_0 : i32, i32
  }
  func.func @transform_4(%arg0: i32) -> (i32, i32) {
    %c0_i32 = arith.constant 0 : i32
    %c0_i32_0 = arith.constant 0 : i32
    %c0_i32_1 = arith.constant 0 : i32
    return %c0_i32, %c0_i32_0 : i32, i32
  }
  func.func @transform_5(%arg0: i32) -> (i32, i32) {
    %c0_i32 = arith.constant 0 : i32
    %c0_i32_0 = arith.constant 0 : i32
    %c0_i32_1 = arith.constant 0 : i32
    return %c0_i32, %c0_i32_0 : i32, i32
  }
  func.func @transform_6(%arg0: i32) -> (i32, i32) {
    %c0_i32 = arith.constant 0 : i32
    %c0_i32_0 = arith.constant 0 : i32
    %c0_i32_1 = arith.constant 0 : i32
    return %c0_i32, %c0_i32_0 : i32, i32
  }
  func.func @transform_7(%arg0: i32) -> (i32, i32) {
    %c0_i32 = arith.constant 0 : i32
    %c0_i32_0 = arith.constant 0 : i32
    return %arg0, %c0_i32 : i32, i32
  }
}

</mosaic_0001>

<bundles_post_ra>
// kernel: neural_network_forward.1
= control target key start
LH: loop header
LB: loop body
LE: loop exit
PB: predicated region body
PF: predicated region fallthrough
CT: control target
= control target key end

     0   :  { %12 = vsyncpa [#allocation3], 0  ;;  %s778_s0 = inlined_call_operand.vmem [shape: f32[8,128], index: 0, kind: input, shape index: {}]   ;;  %s779_s1 = inlined_call_operand.vmem [shape: bf16[128,128], index: 1, kind: input, shape index: {}]   ;;  %s780_s2 = inlined_call_operand.vmem [shape: f32[1,128], index: 2, kind: input, shape index: {}]   ;;  %s781_s3 = inlined_call_operand.hbm [shape: bf16[128,128], index: 3, kind: input, shape index: {}]   ;;  %s782_s4 = inlined_call_operand.vmem [shape: f32[1,128], index: 4, kind: input, shape index: {}]   ;;  %s783_s5 = inlined_call_operand.hbm [shape: bf16[128,128], index: 5, kind: input, shape index: {}]   ;;  %s784_s6 = inlined_call_operand.vmem [shape: f32[1,128], index: 6, kind: input, shape index: {}]   ;;  %s785_s7 = inlined_call_operand.hbm [shape: f32[8,128], index: 7, kind: output, shape index: {}]  }
   0x1   :  { %13 = vsyncpa [#allocation6], 0 }
   0x2   :  { %14 = vsyncpa [#allocation4], 0  ;;  %s629_s24 = smov [#allocation2]   ;;  %s557_s28 = scalar_lea.hbm %s781_s3, 1024 }
   0x3   :  { %s26_s25 = sshll.u32 %s629_s24, 4  ;;  %p558_p0 = scmp.ne.s32.totalorder %s781_s3, %s557_s28  ;;  %s27_s25 = int_to_ptr.vmem [resolvable:$true] %s26_s25 }
   0x4   :  { %p561_p1 = scmp.lt.u32.totalorder %s557_s28, %s781_s3 }
   0x6   :  { %p563_p2 = pnand %p561_p1, %p558_p0 }
   0x8   :  { %566 = shalt.err (!%p563_p2)
}
   0x9   :  { %s567_s10 = scalar_lea.vmem %s27_s25, 1024  ;;  %p572_p4 = scmp.lt.s32.totalorder %s27_s25, %s27_s25 }
   0xa   :  { %p568_p3 = scmp.ne.s32.totalorder %s27_s25, %s567_s10  ;;  %p573_p5 = scmp.lt.s32.totalorder %s567_s10, %s567_s10 }
   0xc   :  { %p574_p6 = por %p573_p5, %p572_p4 }
   0xe   :  { %p575_p7 = pnand %p574_p6, %p568_p3 }
  0x10   :  { %578 = shalt.err (!%p575_p7)
}
  0x11   :  { %s630_s11 = smov 64   ;;  %s631_s12 = smov 4  }
  0x12   :  { %32 = dma.hbm_to_vmem [thread:$0]  %s781_s3, 1024, %s27_s25, [#allocation3], %s630_s11, %s630_s11, %s631_s12  }
  0x13   :  { %s632_s15 = smov [#allocation5]   ;;  %s579_s19 = scalar_lea.hbm %s783_s5, 1024 }
  0x14   :  { %s40_s16 = sshll.u32 %s632_s15, 4  ;;  %p580_p8 = scmp.ne.s32.totalorder %s783_s5, %s579_s19  ;;  %s41_s16 = int_to_ptr.vmem [resolvable:$true] %s40_s16 }
  0x15   :  { %p583_p9 = scmp.lt.u32.totalorder %s579_s19, %s783_s5 }
  0x17   :  { %p585_p10 = pnand %p583_p9, %p580_p8 }
  0x19   :  { %588 = shalt.err (!%p585_p10)
}
  0x1a   :  { %s589_s24 = scalar_lea.vmem %s41_s16, 1024  ;;  %p594_p12 = scmp.lt.s32.totalorder %s41_s16, %s41_s16 }
  0x1b   :  { %p590_p11 = scmp.ne.s32.totalorder %s41_s16, %s589_s24  ;;  %p595_p13 = scmp.lt.s32.totalorder %s589_s24, %s589_s24 }
  0x1d   :  { %p596_p0 = por %p595_p13, %p594_p12 }
  0x1f   :  { %p597_p1 = pnand %p596_p0, %p590_p11 }
  0x21   :  { %600 = shalt.err (!%p597_p1)
}
  0x22   :  { %46 = dma.hbm_to_vmem [thread:$0]  %s783_s5, 1024, %s41_s16, [#allocation6], %s630_s11, %s630_s11, %s631_s12  }
  0x23   :  { %623 = dma.done.wait [#allocation3], 1024  }
  0x24   :  { %624 = vsyncadd [#allocation3], 4294966272 }
  0x25   :  { %625 = dma.done.wait [#allocation6], 1024  }
  0x26   :  { %626 = vsyncadd [#allocation6], 4294966272  ;;  %v633_v0 = vmov 0.0   ;;  %vm634_vm0 = vmmov 0   ;;  %v533_v1 = vld [vmem:[%s779_s1] sm:$0xff]   ;;  %v534_v2 = vld [vmem:[%s779_s1 + $0x8] sm:$0xff]  }
  0x27   :  { %466 = vmatprep.subr.bf16.mxu0 %v633_v0  ;;  %482 = vmatprep.mubr.msk.bf16.mxu0 %vm634_vm0, %v633_v0  ;;  %v535_v3 = vld [vmem:[%s779_s1 + $0x10] sm:$0xff]   ;;  %v541_v4 = vld [vmem:[#allocation2] sm:$0xff]   ;;  %v536_v5 = vld [vmem:[%s779_s1 + $0x18] sm:$0xff]   ;;  %s635_s23 = smov [#allocation7]  }
  0x28   :  { %486 = vmatprep.subr.bf16.mxu1 %v633_v0  ;;  %502 = vmatprep.mubr.msk.bf16.mxu1 %vm634_vm0, %v633_v0  ;;  %v542_v6 = vld [vmem:[#allocation2 + $0x8] sm:$0xff]   ;;  %v537_v7 = vld [vmem:[%s779_s1 + $0x20] sm:$0xff]   ;;  %v543_v8 = vld [vmem:[#allocation2 + $0x10] sm:$0xff]   ;;  %s402_s24 = sshll.u32 %s635_s23, 4  ;;  %s403_s24 = int_to_ptr.vmem [resolvable:$true] %s402_s24 }
  0x29   :  { %467 = vmatpush3.bf16.msra.mxu0 %v533_v1  ;;  %487 = vmatpush3.bf16.msra.mxu1 %v541_v4  ;;  %v538_v9 = vld [vmem:[%s779_s1 + $0x28] sm:$0xff]   ;;  %v544_v10 = vld [vmem:[#allocation2 + $0x18] sm:$0xff]   ;;  %v539_v11 = vld [vmem:[%s779_s1 + $0x30] sm:$0xff]   ;;  %p606_p3 = scmp.lt.s32.totalorder %s403_s24, %s403_s24 }
  0x2a   :  { %468 = vmatprep.subr.bf16.mxu0 %v633_v0  ;;  %488 = vmatprep.subr.bf16.mxu1 %v633_v0  ;;  %v545_v12 = vld [vmem:[#allocation2 + $0x20] sm:$0xff]   ;;  %v540_v13 = vld [vmem:[%s779_s1 + $0x38] sm:$0xff]   ;;  %v546_v15 = vld [vmem:[#allocation2 + $0x28] sm:$0xff]  }
  0x2b   :  { %v56_v14 = vld [vmem:[%s778_s0] sm:$0xff]  ;;  %v547_v17 = vld [vmem:[#allocation2 + $0x30] sm:$0xff]   ;;  %v548_v18 = vld [vmem:[#allocation2 + $0x38] sm:$0xff]  }
  0x2c   :  { %v74_v16 = vpack.c.bf16 %v56_v14, %v56_v14  ;;  %v549_v19 = vld [vmem:[#allocation5] sm:$0xff]   ;;  %v550_v20 = vld [vmem:[#allocation5 + $0x8] sm:$0xff]   ;;  %v551_v21 = vld [vmem:[#allocation5 + $0x10] sm:$0xff]  }
  0x2d   :  { %469 = vmatpush3.bf16.msra.mxu0 %v534_v2  ;;  %489 = vmatpush3.bf16.msra.mxu1 %v542_v6  ;;  %v552_v22 = vld [vmem:[#allocation5 + $0x18] sm:$0xff]   ;;  %v553_v23 = vld [vmem:[#allocation5 + $0x20] sm:$0xff]   ;;  %v554_v24 = vld [vmem:[#allocation5 + $0x28] sm:$0xff]  }
  0x2e   :  { %470 = vmatprep.subr.bf16.mxu0 %v633_v0  ;;  %490 = vmatprep.subr.bf16.mxu1 %v633_v0  ;;  %v412_v25 = vld [vmem:[%s780_s2] ss:$0 sm:$0xff]  ;;  %v555_v33 = vld [vmem:[#allocation5 + $0x30] sm:$0xff]   ;;  %v556_v34 = vld [vmem:[#allocation5 + $0x38] sm:$0xff]  }
  0x2f   :  { %v421_v35 = vld [vmem:[%s782_s4] ss:$0 sm:$0xff]  ;;  %s601_s4 = scalar_lea.vmem %s403_s24, 128 }
  0x30   :  { %v430_v43 = vld [vmem:[%s784_s6] ss:$0 sm:$0xff]  ;;  %p602_p2 = scmp.ne.s32.totalorder %s403_s24, %s601_s4  ;;  %p607_p4 = scmp.lt.s32.totalorder %s601_s4, %s601_s4 }
  0x31   :  { %471 = vmatpush3.bf16.msra.mxu0 %v535_v3  ;;  %491 = vmatpush3.bf16.msra.mxu1 %v543_v8 }
  0x32   :  { %472 = vmatprep.subr.bf16.mxu0 %v633_v0  ;;  %492 = vmatprep.subr.bf16.mxu1 %v633_v0  ;;  %p608_p5 = por %p607_p4, %p606_p3 }
  0x34   :  { %p609_p6 = pnand %p608_p5, %p602_p2 }
  0x35   :  { %473 = vmatpush3.bf16.msra.mxu0 %v536_v5  ;;  %493 = vmatpush3.bf16.msra.mxu1 %v544_v10 }
  0x36   :  { %474 = vmatprep.subr.bf16.mxu0 %v633_v0  ;;  %494 = vmatprep.subr.bf16.mxu1 %v633_v0 }
  0x39   :  { %475 = vmatpush3.bf16.msra.mxu0 %v537_v7  ;;  %495 = vmatpush3.bf16.msra.mxu1 %v545_v12 }
  0x3a   :  { %476 = vmatprep.subr.bf16.mxu0 %v633_v0  ;;  %496 = vmatprep.subr.bf16.mxu1 %v633_v0 }
  0x3d   :  { %477 = vmatpush3.bf16.msra.mxu0 %v538_v9  ;;  %497 = vmatpush3.bf16.msra.mxu1 %v546_v15 }
  0x3e   :  { %478 = vmatprep.subr.bf16.mxu0 %v633_v0  ;;  %498 = vmatprep.subr.bf16.mxu1 %v633_v0 }
  0x41   :  { %479 = vmatpush3.bf16.msra.mxu0 %v539_v11  ;;  %499 = vmatpush3.bf16.msra.mxu1 %v547_v17 }
  0x42   :  { %480 = vmatprep.subr.bf16.mxu0 %v633_v0  ;;  %500 = vmatprep.subr.bf16.mxu1 %v633_v0 }
  0x45   :  { %481 = vmatpush3.bf16.msra.mxu0 %v540_v13  ;;  %501 = vmatpush3.bf16.msra.mxu1 %v548_v18 }
  0x46   :  { %506 = vmatprep.subr.bf16.mxu0 %v633_v0 }
  0x48   :  { %483 = vmatmul.mubr.bf16.vlgmr.msra.gmra.mrb[0].mxu0 %v74_v16 }
  0x49   :  { %522 = vmatprep.mubr.msk.bf16.mxu0 %vm634_vm0, %v633_v0  ;;  %507 = vmatpush3.bf16.msra.mxu0 %v549_v19 }
  0x4a   :  { %508 = vmatprep.subr.bf16.mxu0 %v633_v0 }
  0x4d   :  { %509 = vmatpush3.bf16.msra.mxu0 %v550_v20 }
  0x4e   :  { %510 = vmatprep.subr.bf16.mxu0 %v633_v0 }
  0x51   :  { %511 = vmatpush3.bf16.msra.mxu0 %v551_v21 }
  0x52   :  { %512 = vmatprep.subr.bf16.mxu0 %v633_v0 }
  0x55   :  { %513 = vmatpush3.bf16.msra.mxu0 %v552_v22 }
  0x56   :  { %514 = vmatprep.subr.bf16.mxu0 %v633_v0 }
  0x59   :  { %515 = vmatpush3.bf16.msra.mxu0 %v553_v23 }
  0x5a   :  { %516 = vmatprep.subr.bf16.mxu0 %v633_v0 }
  0x5d   :  { %517 = vmatpush3.bf16.msra.mxu0 %v554_v24 }
  0x5e   :  { %518 = vmatprep.subr.bf16.mxu0 %v633_v0 }
  0x61   :  { %519 = vmatpush3.bf16.msra.mxu0 %v555_v33 }
  0x62   :  { %520 = vmatprep.subr.bf16.mxu0 %v633_v0 }
  0x65   :  { %521 = vmatpush3.bf16.msra.mxu0 %v556_v34 }
 0x11b   :  { %v163_v26 = vpop.f32.mrb[0].mxu0 }
 0x11c   :  { %v164_v27 = vadd.f32 %v412_v25, %v163_v26  ;;  %v484_v28 = vpop.f32.mrb[1].mxu0 }
 0x11d   :  { %v166_v29 = vpop.f32.mrb[2].mxu0 }
 0x11e   :  { %v169_v30 = vmax.f32 %v164_v27, 0.0  ;;  %v485_v31 = vpop.f32.mrb[3].mxu0 }
 0x120   :  { %v187_v32 = vpack.c.bf16 %v169_v30, %v169_v30 }
 0x122   :  { %503 = vmatmul.mubr.bf16.vlgmr.msra.gmra.mrb[0].mxu1 %v187_v32 }
 0x1f5   :  { %v276_v36 = vpop.f32.mrb[0].mxu1 }
 0x1f6   :  { %v277_v37 = vadd.f32 %v421_v35, %v276_v36  ;;  %v504_v38 = vpop.f32.mrb[1].mxu1 }
 0x1f7   :  { %v279_v39 = vpop.f32.mrb[2].mxu1 }
 0x1f8   :  { %v282_v40 = vmax.f32 %v277_v37, 0.0  ;;  %v505_v41 = vpop.f32.mrb[3].mxu1 }
 0x1fa   :  { %v300_v42 = vpack.c.bf16 %v282_v40, %v282_v40 }
 0x1fc   :  { %523 = vmatmul.mubr.bf16.vlgmr.msra.gmra.mrb[4].mxu0 %v300_v42 }
 0x2cf   :  { %v389_v44 = vpop.f32.mrb[4].mxu0 }
 0x2d0   :  { %v390_v45 = vadd.f32 %v430_v43, %v389_v44  ;;  %v524_v46 = vpop.f32.mrb[5].mxu0 }
 0x2d1   :  { %v392_v47 = vpop.f32.mrb[6].mxu0 }
 0x2d2   :  { %395 = vst [vmem:[#allocation7] sm:$0xff] %v390_v45  ;;  %v525_v48 = vpop.f32.mrb[7].mxu0 }
 0x2d3   :  { %612 = shalt.err (!%p609_p6)
}
 0x2d4   :  { %s613_s6 = scalar_lea.hbm %s785_s7, 128 }
 0x2d5   :  { %p614_p7 = scmp.ne.s32.totalorder %s785_s7, %s613_s6  ;;  %p617_p8 = scmp.lt.u32.totalorder %s613_s6, %s785_s7 }
 0x2d7   :  { %p619_p9 = pnand %p617_p8, %p614_p7 }
 0x2d9   :  { %622 = shalt.err (!%p619_p9)
}
 0x2da   :  { %405 = dma.vmem_to_hbm [thread:$0]  %s403_s24, 128, %s785_s7, [#allocation4]  }
 0x2db   :  { %627 = dma.done.wait [#allocation4], 128  }
 0x2dc   :  { %628 = vsyncadd [#allocation4], 4294967168 }
 0x2dd   :  { %409 = vsyncpa [#allocation3], 1 }
 0x2de   :  { %410 = vsyncpa [#allocation6], 1 }
 0x2df   :  { %411 = vsyncpa [#allocation4], 1 }

</bundles_post_ra>
